<compile_context>
chip_gen: v7x
topology: tpu7x:2x2x1
jax: 0.10.0
libtpu: 0.0.40
codegen_flags: <defaults>
</compile_context>

<pallas_src>
import jax
import jax.numpy as jnp
from jax import lax
from jax.experimental import pallas as pl
from jax.experimental.pallas import tpu as pltpu


EMBED_DIM = 256          # lane-dense last dim (2 x 128)
_SUBLANE = 8
_MAX_BLOCK_ROWS = 512    # 512 x 256 x f32 = 512 KiB/block (1 MiB double-buffered)


def _round_up(x, m):
    return ((x + m - 1) // m) * m


def _vmem_budget_bytes():
    """Generation-aware VMEM budget for the resident-table fast path."""
    budget = 32 * 1024 * 1024                      # safe default on every generation
    try:
        phys = getattr(pltpu.get_tpu_info(), "vmem_capacity_bytes", 0) or 0
        if phys >= 128 * 1024 * 1024:              # v5e / v6e: 128 MiB physical VMEM
            budget = 96 * 1024 * 1024
        elif phys >= 64 * 1024 * 1024:             # v7x: 64 MiB per TensorCore
            budget = 40 * 1024 * 1024
    except Exception:
        pass
    return budget


def _choose_block_rows(n_rows):
    """Pick a large, sublane-aligned rows-per-step; keep >=2 steps for small N."""
    rounded = _round_up(max(n_rows, 1), _SUBLANE)
    if rounded <= _SUBLANE:
        return _SUBLANE
    half = _round_up(-(-n_rows // 2), _SUBLANE)    # ceil(N/2) rounded to sublane
    return min(_MAX_BLOCK_ROWS, half)


def _gather_vmem_kernel(ids_ref, table_ref, out_ref):
    """Fast path: table resident in VMEM; gather rows via dynamic ref indexing.

    ids_ref   : SMEM (n_pad,) int32   -- scalar-prefetched token ids
    table_ref : VMEM (V, D)           -- resident across the whole grid
    out_ref   : VMEM (block_rows, D)  -- current output block
    """
    block_rows = out_ref.shape[0]
    base = pl.program_id(0) * block_rows

    def copy_row(r, carry):
        row = ids_ref[base + r]
        out_ref[pl.ds(r, 1), :] = table_ref[pl.ds(row, 1), :]
        return carry

    lax.fori_loop(0, block_rows, copy_row, 0)


def _gather_hbm_kernel(ids_ref, table_hbm, out_ref, sem):
    """Large-vocab path: overlapped per-row HBM DMAs straight into out_ref.

    ids_ref   : SMEM (n_pad,) int32   -- scalar-prefetched token ids
    table_hbm : HBM  (V, D)           -- raw ref (memory_space=pl.ANY), no auto-DMA
    out_ref   : VMEM (block_rows, D)  -- current output block (DMA destination)
    sem       : single shared DMA semaphore
    """
    block_rows = out_ref.shape[0]
    base = pl.program_id(0) * block_rows

    # Issue every row DMA before the first wait so the DMA engine overlaps them.
    def issue(r, carry):
        row = ids_ref[base + r]
        pltpu.make_async_copy(
            table_hbm.at[pl.ds(row, 1), :],
            out_ref.at[pl.ds(r, 1), :],
            sem,
        ).start()
        return carry

    lax.fori_loop(0, block_rows, issue, 0)

    # Drain the shared semaphore: every row copy must be complete before the
    # body returns so Pallas's output writeback never races the gather.
    def drain(r, carry):
        pltpu.make_async_copy(
            table_hbm.at[pl.ds(0, 1), :],          # only dst shape matters for wait
            out_ref.at[pl.ds(r, 1), :],
            sem,
        ).wait()
        return carry

    lax.fori_loop(0, block_rows, drain, 0)


def embedding_lookup(ids, table, *, force_hbm_gather=False):
    """ids: (B, S) int32, table: (V, D) -> (B, S, D); exact row gather."""
    B, S = ids.shape
    V, D = table.shape
    N = B * S

    block_rows = _choose_block_rows(N)
    n_steps = -(-N // block_rows)
    n_pad = n_steps * block_rows

    # Clamp (matches jnp.take's TPU clamping) and pad N up to a full block.
    ids_flat = jnp.clip(ids.reshape(N).astype(jnp.int32), 0, V - 1)
    if n_pad != N:
        ids_flat = jnp.pad(ids_flat, (0, n_pad - N))

    itemsize = jnp.dtype(table.dtype).itemsize
    table_bytes = V * D * itemsize
    out_buf_bytes = 2 * block_rows * D * itemsize          # double-buffered output
    budget = _vmem_budget_bytes()
    use_vmem_table = (not force_hbm_gather) and (
        table_bytes + out_buf_bytes + (1 << 20) <= budget)

    cost = pl.CostEstimate(
        flops=0, transcendentals=0,
        bytes_accessed=2 * n_pad * D * itemsize + n_pad * 4)

    if use_vmem_table:
        kernel = _gather_vmem_kernel
        in_specs = [pl.BlockSpec((V, D), lambda i, _ids: (0, 0))]   # resident table
        scratch_shapes = []
        vmem_limit = min(budget, table_bytes + out_buf_bytes + (16 << 20))
    else:
        kernel = _gather_hbm_kernel
        in_specs = [pl.BlockSpec(memory_space=pl.ANY)]              # table stays in HBM
        scratch_shapes = [pltpu.SemaphoreType.DMA(())]              # single shared sem
        vmem_limit = 32 * 1024 * 1024

    out = pl.pallas_call(
        kernel,
        out_shape=jax.ShapeDtypeStruct((n_pad, D), table.dtype),
        grid_spec=pltpu.PrefetchScalarGridSpec(
            num_scalar_prefetch=1,                                  # ids -> SMEM
            grid=(n_steps,),
            in_specs=in_specs,
            out_specs=pl.BlockSpec((block_rows, D), lambda i, _ids: (i, 0)),
            scratch_shapes=scratch_shapes,
        ),
        compiler_params=pltpu.CompilerParams(
            dimension_semantics=("parallel",),                      # split N across TCs
            vmem_limit_bytes=vmem_limit,
        ),
        cost_estimate=cost,
    )(ids_flat, table)

    return out[:N].reshape(B, S, D)


class AttentionDecoder:
    """JAX mirror of the (mostly empty) PyTorch AttentionDecoder."""

    EMBED_DIM = EMBED_DIM

    def __init__(self, hidden_size, output_size, encoder_output, *, key):
        self.hidden_size = hidden_size
        self.output_size = output_size
        self.encoder_output = encoder_output
        # Deterministic init of the embedding table (matches nn.Embedding shape).
        self.embedding = jax.random.normal(
            key, (output_size, self.EMBED_DIM), dtype=jnp.float32)

    def embed(self, token_ids):
        # The only well-defined compute in the reference module.
        return embedding_lookup(token_ids, self.embedding)

    def forward(self):
        # TODO(synk): reference forward() is `pass` -- nothing to translate.
        return None

    def initHidden(self):
        # TODO(synk): reference initHidden() is `pass` -- nothing to translate.
        return None


if __name__ == "__main__":
    key = jax.random.PRNGKey(0)
    k_tbl, k_ids = jax.random.split(key)

    hidden_size = 32
    output_size = 32   # vocab size
    B, S = 2, 8

    dec = AttentionDecoder(hidden_size, output_size, encoder_output=None, key=k_tbl)
    token_ids = jax.random.randint(k_ids, (B, S), 0, output_size, dtype=jnp.int32)

    # Pure-JAX reference (the gather is a bit-exact copy).
    ref = jnp.take(dec.embedding, token_ids, axis=0)

    # Fast path: table resident in VMEM (taken automatically for this 32 KiB table).
    out_fast = jax.block_until_ready(dec.embed(token_ids))
    assert out_fast.shape == (B, S, AttentionDecoder.EMBED_DIM)
    assert jnp.array_equal(out_fast, ref)

    # Also exercise the large-vocab HBM DMA-gather path on the same inputs.
    out_dma = jax.block_until_ready(
        embedding_lookup(token_ids, dec.embedding, force_hbm_gather=True))
    assert jnp.array_equal(out_dma, ref)

    print("KERNEL_OK")
</pallas_src>

<mosaic_0001>
module attributes {stable_mosaic.version = 11 : i64} {
  func.func @_gather_vmem_kernel(%arg0: i32, %arg1: memref<16xi32, #tpu.memory_space<smem>>, %arg2: memref<32x256xf32, #tpu.memory_space<vmem>>, %arg3: memref<8x256xf32, #tpu.memory_space<vmem>>) attributes {dimension_semantics = [#tpu.dimension_semantics<parallel>], iteration_bounds = array<i64: 2>, scalar_prefetch = 1 : i64, scratch_operands = 0 : i64, tpu.core_type = #tpu.core_type<tc>, window_params = [{pipeline_mode = #tpu.pipeline_mode<synchronous>, transform_indices = @transform_0, window_bounds = array<i64: 32, 256>}, {transform_indices = @transform_1, window_bounds = array<i64: 8, 256>}]} {
    %c8_i32 = arith.constant 8 : i32
    %0 = arith.muli %arg0, %c8_i32 : i32
    %c0_i32 = arith.constant 0 : i32
    %c8_i32_0 = arith.constant 8 : i32
    %1 = arith.addi %c0_i32, %c8_i32_0 : i32
    %c1_i32 = arith.constant 1 : i32
    scf.for %arg4 = %c0_i32 to %1 step %c1_i32  : i32 {
      %2 = arith.addi %0, %arg4 : i32
      %3 = arith.index_cast %2 : i32 to index
      %4 = memref.load %arg1[%3] : memref<16xi32, #tpu.memory_space<smem>>
      %5 = arith.index_cast %4 : i32 to index
      %c0 = arith.constant 0 : index
      %6 = vector.load %arg2[%5, %c0] : memref<32x256xf32, #tpu.memory_space<vmem>>, vector<1x256xf32>
      %7 = arith.index_cast %arg4 : i32 to index
      %c0_2 = arith.constant 0 : index
      %8 = vector.load %arg3[%7, %c0_2] : memref<8x256xf32, #tpu.memory_space<vmem>>, vector<1x256xf32>
      tpu.vector_store %arg3[%7, %c0_2], %6 {strides = array<i32>} : memref<8x256xf32, #tpu.memory_space<vmem>>, vector<1x256xf32>,
    }
    %c8_i32_1 = arith.constant 8 : i32
    return
  }
  func.func @transform_0(%arg0: i32, %arg1: memref<16xi32, #tpu.memory_space<smem>>) -> (i32, i32) {
    %c0_i32 = arith.constant 0 : i32
    %c0_i32_0 = arith.constant 0 : i32
    %c0_i32_1 = arith.constant 0 : i32
    return %c0_i32, %c0_i32_0 : i32, i32
  }
  func.func @transform_1(%arg0: i32, %arg1: memref<16xi32, #tpu.memory_space<smem>>) -> (i32, i32) {
    %c0_i32 = arith.constant 0 : i32
    %c0_i32_0 = arith.constant 0 : i32
    return %arg0, %c0_i32 : i32, i32
  }
}

</mosaic_0001>

<bundles_post_ra>
// kernel: tpu_custom_call.1
= control target key start
LH: loop header
LB: loop body
LE: loop exit
PB: predicated region body
PF: predicated region fallthrough
CT: control target
= control target key end

     0   :  { %s589_s0 = inlined_call_operand.hbm [shape: s32[16], index: 0, kind: input, shape index: {}]   ;;  %s590_s1 = inlined_call_operand.hbm [shape: f32[32,256], index: 1, kind: input, shape index: {}]   ;;  %s591_s2 = inlined_call_operand.hbm [shape: f32[16,256], index: 2, kind: output, shape index: {}]  }
   0x1   :  { %s312_s11 = scalar_lea.hbm %s589_s0, 16 }
   0x2   :  { %p313_p0 = scmp.ne.s32.totalorder %s589_s0, %s312_s11  ;;  %p316_p1 = scmp.lt.u32.totalorder %s312_s11, %s589_s0 }
   0x4   :  { %p318_p2 = pnand %p316_p1, %p313_p0 }
   0x6   :  { %321 = shalt.err (!%p318_p2)  }
   0x7   :  { %s428_s16 = smov [#allocation3]  }
   0x8   :  { %8 = dma.hbm_to_smem %s589_s0, 16, %s428_s16, [#allocation2] }
   0x9   :  { %398 = dma.done.wait [#allocation2], 16 }
   0xa   :  { %399 = vsyncadd [#allocation2], 4294967280 }
   0xb   :  { %10 = sfence }
   0xc   :  { %11 = vsyncpa [#allocation5], 0 }
   0xd   :  { %12 = vsyncpa [#allocation6], 0 }
   0xe   :  { %14 = vsyncpa [#allocation6 + $0x1], 0  ;;  %s460_s19 = smov 0   ;;  %s462_s20 = smov 0  }
   0xf   :  { %s464_s21 = smov 0   ;;  %s466_s22 = smov 0  }
  0x10 LB: > { %s481_s0 = sadd.s32 4294967295, %s422_s22   ;;  %s232_s23 = sadd.s32 4294967294, %s422_s22   ;;  %s422_s22 = sphi %s466_s22, %s607_s22   ;;  %s418_s21 = sphi %s464_s21, %s606_s21   ;;  %s414_s20 = sphi %s462_s20, %s605_s20   ;;  %s410_s19 = sphi %s460_s19, %s604_s19  }
  0x11   : > { %s485_s24 = sadd.s32 1, %s422_s22   ;;  %s48_s25 = sadd.s32 1, %s418_s21 }
  0x12   : > { %s45_s26 = ssub.s32 %s422_s22, %s485_s24  ;;  %p58_p3 = scmp.ne.s32.totalorder %s418_s21, %s414_s20 }
  0x13   : > { %p46_p4 = scmp.eq.s32.totalorder %s45_s26, 0  ;;  %p59_p5 = scmp.eq.s32.totalorder %s481_s0, 1 }
  0x14   : > { %p64_p6 = scmp.ne.s32.totalorder %s414_s20, %s410_s19  ;;  %p65_p7 = scmp.eq.s32.totalorder %s232_s23, 1 }
  0x15   : > { %s496_s27 = scalar_select %p46_p4, %s418_s21, %s48_s25  }
  0x16   : > { %p498_p8 = por %p59_p5, %p58_p3  ;;  %p502_p9 = por %p65_p7, %p64_p6 }
  0x17   : > { %p233_p10 = scmp.ge.s32.totalorder %s422_s22, 1  ;;  %p72_p11 = scmp.lt.s32.totalorder %s422_s22, 3 }
  0x18   : > { %s595_s28 = scalar_select %p498_p8, 1, 0 }
  0x19   : > { %s596_s29 = scalar_select %p502_p9, 1, 0 }
  0x1a   : > { %p592_p12 = scmp.eq.s32.totalorder %s481_s0, 0  ;;  %p509_p13 = pnand %p233_p10, %p72_p11 }
  0x1b   : > { %s429_s3 = smov [#allocation4]   ;;  %s322_s8 = scalar_lea.hbm %s590_s1, 1024 }
  0x1c   : > { %s597_s30 = scalar_select %p509_p13, 1, 0 }
  0x1d   : > { %s84_s4 = sshll.u32 %s429_s3, 4  ;;  %p257_p0 = pneg %p509_p13  ;;  %s85_s4 = int_to_ptr.vmem [resolvable:$true] %s84_s4 }
  0x1e   : > { %p323_p2 = scmp.ne.s32.totalorder %s590_s1, %s322_s8  ;;  %p329_p6 = scmp.lt.u32.totalorder %s322_s8, %s590_s1 }
  0x1f   : > { %p517_p1 = pnand %p592_p12, %p257_p0 }
  0x21   : > { %p324_p3 = pneg %p517_p1 }
  0x23   : > { %p325_p4 = pnand %p324_p3, %p323_p2 }
  0x25   : > { %p326_p5 = pneg %p325_p4 }
  0x27   : > { %p331_p7 = pnand %p329_p6, %p326_p5 }
  0x29   : > { %334 = shalt.err (!%p331_p7)
}
  0x2a   : > { %s335_s13 = scalar_lea.vmem %s85_s4, 1024  ;;  %p343_p12 = scmp.lt.s32.totalorder %s85_s4, %s85_s4 }
  0x2b   : > { %p336_p10 = scmp.ne.s32.totalorder %s85_s4, %s335_s13  ;;  %p344_p9 = scmp.lt.s32.totalorder %s335_s13, %s335_s13 }
  0x2d   : > { %p338_p11 = pnand %p336_p10, %p324_p3  ;;  %p345_p8 = por %p344_p9, %p343_p12 }
  0x2f   : > { %p339_p0 = pneg %p338_p11 }
  0x31   : > { %p346_p13 = pnand %p345_p8, %p339_p0 }
  0x33   : > { %349 = shalt.err (!%p346_p13)
}
  0x34   : > { %s430_s14 = smov 256   ;;  %s431_s15 = smov 16  }
  0x35   : > { %260 = dma.hbm_to_vmem [thread:$0]  (!%p517_p1), %s590_s1, 1024, %s85_s4, [#allocation5], %s430_s14, %s430_s14, %s431_s15  }
  0x36   : > { %p599_p2 = scmp.ne.s32.totalorder %s597_s30, 0 }
  0x37   : > { %p600_p4 = scmp.eq.s32.totalorder (!%p599_p2), %s481_s0, 0 }
  0x38   : > { %100 = sbr.rel (%p599_p2) target bundleno = 100 (0x64), region = 24 }
  0x3f   : > { %401 = dma.done.wait (%p600_p4), [#allocation5], 1024   ;;  %p601_p3 = pmov %p600_p4 }
  0x40   : > { %s112_s18 = sand.u32 1, %s414_s20   ;;  %s238_s23 = sshll.u32 %s481_s0, 3 }
  0x41   : > { %403 = vsyncadd (%p601_p3), [#allocation5], 4294966272  ;;  %s237_s25 = sshll.u32 %s112_s18, 4  ;;  %s424_s3 = smov 0  }
  0x42   : > { %s114_s26 = scalar_lea.vmem [#allocation7], %s237_s25 }
  0x43 LB: >> { %s122_s30 = sadd.s32 %s426_s3, %s238_s23  ;;  %s137_s4 = sshra.s32 %s426_s3, 3  ;;  %v133_v0 = vlaneseq  ;;  %s426_s3 = sphi %s424_s3, %s121_s3  }
  0x44   : >> { %s123_s5 = sld [smem:[#allocation3 + %s122_s30]]  ;;  %s140_s6 = sand.u32 7, %s426_s3 }
  0x45   : >> { %s249_s7 = sshll.u32 %s137_s4, 4  ;;  %vm135_vm0 = vcmp.lt.s32.totalorder %v133_v0, 256  ;;  %s121_s3 = sadd.s32 1, %s426_s3  }
  0x46   : >> { %s143_s8 = sadd.s32 %s249_s7, %s140_s6  ;;  %p118_p8 = scmp.ge.s32.totalorder %s121_s3, 8  }
  0x47   : >> { %s144_s13 = scalar_lea.vmem %s114_s26, %s143_s8 [#allocation7]  ;;  %s250_s15 = sshll.u32 (%p118_p8), %s481_s0, 8 }
  0x48   : > { %s551_s25 = scalar_lea.hbm (%p118_p8), %s591_s2, %s250_s15  ;;  %s162_s30 = sshll.u32 (%p118_p8), %s114_s26, 4  ;;  %s163_s30 = int_to_ptr.vmem [resolvable:$true] %s162_s30 }
  0x49   : > { %120 = sbr.rel (!%p118_p8) target bundleno = 67 (0x43), region = 70  ;;  %s148_s4 = scalar_lea.sflag (%p118_p8), [#allocation6], %s112_s18 }
  0x4a   : >> { %s124_s9 = sshra.s32 %s123_s5, 3  ;;  %s127_s10 = sand.u32 7, %s123_s5 }
  0x4b   : >> { %s248_s11 = sshll.u32 %s124_s9, 4  ;;  %s350_s5 = scalar_lea.vmem (%p118_p8), %s163_s30, 256 }
  0x4c   : >> { %s130_s12 = sadd.s32 %s248_s11, %s127_s10  ;;  %p351_p9 = scmp.ne.s32.totalorder (%p118_p8), %s163_s30, %s350_s5 }
  0x4d   : >> { %s131_s14 = scalar_lea.vmem [#allocation4], %s130_s12  ;;  %p602_p12 = scmp.ne.s32.totalorder (%p118_p8), %s595_s28, 0 }
  0x4e   : >> { %v132_v1 = vld [vmem:[%s131_s14] ss:$8 sm:$0x3]  ;;  %s432_s3 = smov (%p118_p8), [#allocation7]  }
  0x4f   : >> { %145 = vst.msk [vmem:[%s144_s13] ss:$8 sm:$0x3] %vm135_vm0, %v132_v1  ;;  %p352_p13 = pnand (%p118_p8), %p351_p9, %p602_p12  ;;  %s354_s6 = sshll.u32 (%p118_p8), %s432_s3, 4  ;;  %s355_s6 = int_to_ptr.vmem [resolvable:$false] %s354_s6 }
  0x50   : > { %s356_s23 = scalar_lea.vmem %s355_s6, 512  ;;  %p357_p5 = scmp.lt.s32.totalorder %s163_s30, %s355_s6 }
  0x51   : > { %p353_p1 = pneg %p352_p13  ;;  %p358_p6 = scmp.lt.s32.totalorder %s356_s23, %s350_s5 }
  0x53   : > { %p359_p7 = por %p358_p6, %p357_p5 }
  0x55   : > { %p360_p10 = pnand %p359_p7, %p353_p1 }
  0x57   : > { %363 = shalt.err (!%p360_p10)
}
  0x58   : > { %s364_s0 = scalar_lea.hbm %s551_s25, 256  ;;  %s368_s7 = scalar_lea.hbm %s591_s2, 512 }
  0x59   : > { %p365_p11 = scmp.ne.s32.totalorder %s551_s25, %s364_s0  ;;  %p369_p4 = scmp.lt.u32.totalorder %s551_s25, %s591_s2 }
  0x5a   : > { %p370_p3 = scmp.lt.u32.totalorder %s368_s7, %s364_s0  ;;  %p372_p9 = scmp.lt.u32.totalorder %s364_s0, %s551_s25 }
  0x5b   : > { %p366_p0 = pnand %p365_p11, %p602_p12 }
  0x5c   : > { %p371_p8 = por %p370_p3, %p369_p4 }
  0x5d   : > { %p367_p2 = pneg %p366_p0 }
  0x5e   : > { %p373_p13 = por %p372_p9, %p371_p8 }
  0x60   : > { %p374_p1 = pnand %p373_p13, %p367_p2 }
  0x62   : > { %377 = shalt.err (!%p374_p1)
}
  0x63   : > { %255 = dma.vmem_to_hbm [thread:$0]  (%p602_p12), %s163_s30, 256, %s551_s25, %s148_s4  }
  0x64 PF: > { %p267_p5 = scmp.ge.s32.totalorder %s422_s22, 2  ;;  %s174_s10 = sand.u32 1, %s410_s19  }
  0x65   : > { %p603_p6 = scmp.ne.s32.totalorder %s596_s29, 0  ;;  %s175_s11 = scalar_lea.sflag [#allocation6], %s174_s10 }
  0x67   : > { %p262_p7 = pnand %p267_p5, %p603_p6 }
  0x69   : > { %405 = dma.done.wait (!%p262_p7), %s175_s11, 256  }
  0x6a   : > { %407 = vsyncadd (!%p262_p7), %s175_s11, 4294967040  ;;  %p17_p10 = scmp.ge.s32.totalorder %s485_s24, 4   ;;  %s604_s19 = smov %s414_s20 }
  0x6b   : > { %s605_s20 = smov %s418_s21  ;;  %s606_s21 = smov %s496_s27 }
  0x6c   : > { %s607_s22 = smov %s485_s24  ;;  %19 = sbr.rel (!%p17_p10) target bundleno = 16 (0x10), region = 81 }
  0x73   :  { %180 = vsyncpa [#allocation5], 1 }
  0x74   :  { %182 = vsyncpa [#allocation5 + $0x1], 1 }
  0x75   :  { %183 = vsyncpa [#allocation6], 1 }
  0x76   :  { %185 = vsyncpa [#allocation6 + $0x1], 1 }

</bundles_post_ra>
